<compile_context>
chip_gen: v5e
topology: v5e:2x2
jax: 0.10.0
libtpu: 0.0.40
codegen_flags: <defaults>
</compile_context>

<pallas_src>
import functools

import jax
import jax.numpy as jnp
import numpy as np
from jax.experimental import pallas as pl
from jax.experimental.pallas import tpu as pltpu


# --------------------------------------------------------------------------- #
# Parameter prep (runs ONCE, outside the hot path).
# --------------------------------------------------------------------------- #
def fuse_qkv_params(wq, wk, wv, bq, bk, bv):
    """Fuse the three projections into one (hidden, q_out + 2*kv_out) weight and
    one bias.  Call once (e.g. at model load) and reuse; do NOT call per forward."""
    w_fused = jnp.concatenate([wq, wk, wv], axis=1)
    b_fused = jnp.concatenate([bq, bk, bv]).reshape(1, -1)
    return w_fused, b_fused


# --------------------------------------------------------------------------- #
# Shared epilogue: per-head cast + store (no full-width temp), repeat via
# duplicated stores of the same cached head value.
# --------------------------------------------------------------------------- #
def _emit_head_stores(o_ref, read_cols, bias_f32, *, num_heads, num_kv_heads,
                      head_dim):
    """read_cols(c0) -> (tS, head_dim) f32 slice of the fused projection output
    starting at fused column c0.  bias_f32: (1, full_out) f32 or None if the
    bias was already folded into the values."""
    n_rep = num_heads // num_kv_heads
    q_out = num_heads * head_dim
    kv_out = num_kv_heads * head_dim
    cache = {}

    def head_val(c0):
        if c0 not in cache:
            v = read_cols(c0)
            if bias_f32 is not None:
                v = v + bias_f32[:, c0:c0 + head_dim]
            cache[c0] = v.astype(o_ref.dtype)
        return cache[c0]

    # q heads: output heads 0 .. num_heads-1
    for h in range(num_heads):
        o_ref[0, h] = head_val(h * head_dim)
    # k heads (repeat_interleave over kv heads): num_heads .. 2*num_heads-1
    for h in range(num_heads):
        o_ref[0, num_heads + h] = head_val(q_out + (h // n_rep) * head_dim)
    # v heads: 2*num_heads .. 3*num_heads-1
    for h in range(num_heads):
        o_ref[0, 2 * num_heads + h] = head_val(q_out + kv_out
                                               + (h // n_rep) * head_dim)


# --------------------------------------------------------------------------- #
# Kernels.
# --------------------------------------------------------------------------- #
def _qkv_repeat_resident_kernel(x_ref, w_ref, b_ref, o_ref, *,
                                num_heads, num_kv_heads, head_dim):
    """Weight-resident schedule: the whole fused weight sits in VMEM, one dot
    per (batch, S-tile), no K loop, no accumulator scratch.
    x_ref: (1, tS, hidden)  w_ref: (hidden, full_out)  b_ref: (1, full_out)
    o_ref: (1, 3*num_heads, tS, head_dim)."""
    y = jnp.dot(x_ref[0], w_ref[...], preferred_element_type=jnp.float32)
    bias = b_ref[...].astype(jnp.float32)
    _emit_head_stores(o_ref, lambda c0: y[:, c0:c0 + head_dim], bias,
                      num_heads=num_heads, num_kv_heads=num_kv_heads,
                      head_dim=head_dim)


def _qkv_repeat_ktiled_kernel(x_ref, w_ref, b_ref, o_ref, acc_ref, *,
                              num_heads, num_kv_heads, head_dim):
    """Streamed-weight schedule: grid = (B, S/tS, hidden/tK), K reduction last.
    x_ref: (1, tS, tK)  w_ref: (tK, full_out)  b_ref: (1, full_out)
    o_ref: (1, 3*num_heads, tS, head_dim)  acc_ref: (tS, full_out) f32."""
    k_idx = pl.program_id(2)

    @pl.when(k_idx == 0)
    def _():
        # Fold the bias into the accumulator init: no epilogue bias add.
        acc_ref[...] = jnp.broadcast_to(b_ref[...].astype(jnp.float32),
                                        acc_ref.shape)

    acc_ref[...] += jnp.dot(x_ref[0], w_ref[...],
                            preferred_element_type=jnp.float32)

    @pl.when(k_idx == pl.num_programs(2) - 1)
    def _():
        # Cast + store per head straight out of the accumulator; no (tS, full_out)
        # temp is materialized.
        _emit_head_stores(o_ref, lambda c0: acc_ref[:, c0:c0 + head_dim], None,
                          num_heads=num_heads, num_kv_heads=num_kv_heads,
                          head_dim=head_dim)


# --------------------------------------------------------------------------- #
# Wrapper.
# --------------------------------------------------------------------------- #
def _divisor_tile(dim, target):
    """Largest divisor of `dim` that is <= target (never silently the full dim
    unless dim <= target)."""
    t = min(dim, max(1, target))
    while dim % t:
        t -= 1
    return t


def _vmem_capacity_bytes():
    try:
        return int(pltpu.get_tpu_info().vmem_capacity_bytes)
    except Exception:
        return 64 << 20  # conservative default (v7x per-core VMEM)


def repeat_kv_model_forward(x, w_fused, b_fused, *, num_heads, num_kv_heads,
                            seq_tile=256, k_tile=512, schedule="auto"):
    """x: (B, S, hidden).  w_fused: (hidden, (num_heads + 2*num_kv_heads)*head_dim)
    (torch Linear weights transposed + concatenated — see fuse_qkv_params).
    b_fused: (full_out,) or (1, full_out).
    Returns (B, 3*num_heads, S, head_dim) == cat([q, repeat(k), repeat(v)], dim=1).
    NOTE: pass bf16 x / w_fused where possible; accumulation is f32 either way.
    TODO(synk): ragged S / hidden (non-8/128-friendly divisors) would need
    masked partial tiles; current tiling picks the largest clean divisor."""
    B, S, hidden = x.shape
    assert hidden % num_heads == 0 and num_heads % num_kv_heads == 0
    head_dim = hidden // num_heads
    q_out = num_heads * head_dim
    kv_out = num_kv_heads * head_dim
    full_out = q_out + 2 * kv_out
    out_heads = 3 * num_heads
    assert w_fused.shape == (hidden, full_out), w_fused.shape
    b_fused = b_fused.reshape(1, full_out)

    itemsize = x.dtype.itemsize
    cap = _vmem_capacity_bytes()
    budget = int(cap * 0.85)

    # ---- S tiling (shared by both schedules) ------------------------------ #
    tS = _divisor_tile(S, seq_tile)
    # v7x megacore: make sure the "parallel" axes expose >= 2 blocks of work.
    if B == 1 and S // tS < 2:
        smaller = _divisor_tile(S, max(tS // 2, 8))
        if smaller < tS:
            tS = smaller

    out_row_bytes = out_heads * head_dim * itemsize  # output bytes per S row
    w_bytes = hidden * full_out * itemsize
    flops = 2 * B * S * hidden * full_out
    out_bytes = B * S * out_row_bytes

    def resident_bytes(ts):
        return (2 * w_bytes                     # conservative: 2 weight buffers
                + 2 * ts * hidden * itemsize    # x double-buffered
                + 2 * ts * out_row_bytes        # output block double-buffered
                + ts * full_out * 4)            # f32 matmul result

    if schedule == "auto":
        use_resident = resident_bytes(tS) <= budget
    else:
        use_resident = (schedule == "resident")

    if use_resident:
        kernel = functools.partial(_qkv_repeat_resident_kernel,
                                   num_heads=num_heads,
                                   num_kv_heads=num_kv_heads,
                                   head_dim=head_dim)
        grid_spec = pltpu.PrefetchScalarGridSpec(
            num_scalar_prefetch=0,
            grid=(B, S // tS),
            in_specs=[
                pl.BlockSpec((1, tS, hidden), lambda b, s: (b, s, 0)),
                pl.BlockSpec((hidden, full_out), lambda b, s: (0, 0)),  # resident
                pl.BlockSpec((1, full_out), lambda b, s: (0, 0)),
            ],
            out_specs=pl.BlockSpec((1, out_heads, tS, head_dim),
                                   lambda b, s: (b, 0, s, 0)),
        )
        dim_sem = ("parallel", "parallel")
        bytes_accessed = (x.size * itemsize + w_bytes
                          + b_fused.size * itemsize + out_bytes)
    else:
        # Streamed-weight fallback (v7x 64 MiB VMEM / very wide models).
        # TODO(synk): an extra N (full_out) grid axis would allow even tighter
        # VMEM budgets; for now we shrink tK, then tS, until the footprint fits.
        tK = _divisor_tile(hidden, k_tile)

        def ktiled_bytes(ts, tk):
            return (2 * tk * full_out * itemsize   # weight (double-buffered)
                    + 2 * ts * tk * itemsize       # x (double-buffered)
                    + ts * full_out * 4            # f32 accumulator scratch
                    + 2 * ts * out_row_bytes)      # output block (double-buffered)

        while ktiled_bytes(tS, tK) > budget:
            new_tK = _divisor_tile(hidden, max(tK // 2, 128)) if tK > 128 else tK
            new_tS = _divisor_tile(S, max(tS // 2, 8)) if tS > 8 else tS
            if new_tK < tK:          # shrink K first: weight-stream intensity ~ tS
                tK = new_tK
            elif new_tS < tS:
                tS = new_tS
            else:
                break

        kernel = functools.partial(_qkv_repeat_ktiled_kernel,
                                   num_heads=num_heads,
                                   num_kv_heads=num_kv_heads,
                                   head_dim=head_dim)
        grid_spec = pltpu.PrefetchScalarGridSpec(
            num_scalar_prefetch=0,
            grid=(B, S // tS, hidden // tK),
            in_specs=[
                pl.BlockSpec((1, tS, tK), lambda b, s, k: (b, s, k)),
                pl.BlockSpec((tK, full_out), lambda b, s, k: (k, 0)),
                pl.BlockSpec((1, full_out), lambda b, s, k: (0, 0)),
            ],
            out_specs=pl.BlockSpec((1, out_heads, tS, head_dim),
                                   lambda b, s, k: (b, 0, s, 0)),
            scratch_shapes=[pltpu.VMEM((tS, full_out), jnp.float32)],
        )
        dim_sem = ("parallel", "parallel", "arbitrary")
        bytes_accessed = (x.size * itemsize
                          + w_bytes * B * (S // tS)  # weight re-streamed per S tile
                          + b_fused.size * itemsize
                          + out_bytes)

    return pl.pallas_call(
        kernel,
        out_shape=jax.ShapeDtypeStruct((B, out_heads, S, head_dim), x.dtype),
        grid_spec=grid_spec,
        compiler_params=pltpu.CompilerParams(
            dimension_semantics=dim_sem,
            vmem_limit_bytes=budget),
        cost_estimate=pl.CostEstimate(flops=flops, transcendentals=0,
                                      bytes_accessed=int(bytes_accessed)),
    )(x, w_fused, b_fused)


# --------------------------------------------------------------------------- #
# Pure-JAX reference (mirrors the PyTorch module).
# --------------------------------------------------------------------------- #
def _reference(x, wq, wk, wv, bq, bk, bv, num_heads, num_kv_heads):
    B, S, hidden = x.shape
    head_dim = hidden // num_heads
    n_rep = num_heads // num_kv_heads
    q = (x @ wq + bq).reshape(B, S, num_heads, head_dim).transpose(0, 2, 1, 3)
    k = (x @ wk + bk).reshape(B, S, num_kv_heads, head_dim).transpose(0, 2, 1, 3)
    v = (x @ wv + bv).reshape(B, S, num_kv_heads, head_dim).transpose(0, 2, 1, 3)
    k = jnp.repeat(k, n_rep, axis=1)
    v = jnp.repeat(v, n_rep, axis=1)
    return jnp.concatenate([q, k, v], axis=1)


if __name__ == "__main__":
    # Small shapes consistent with the module.
    batch, seq_len, hidden_size = 2, 8, 32
    num_heads, num_kv_heads = 4, 2
    head_dim = hidden_size // num_heads

    key = jax.random.PRNGKey(0)
    kx, kwq, kwk, kwv, kbq, kbk, kbv = jax.random.split(key, 7)

    x = jax.random.normal(kx, (batch, seq_len, hidden_size), dtype=jnp.float32)
    # "Linear" params stored as (in_features, out_features) = torch weight.T.
    wq = jax.random.normal(kwq, (hidden_size, num_heads * head_dim), jnp.float32) * 0.05
    wk = jax.random.normal(kwk, (hidden_size, num_kv_heads * head_dim), jnp.float32) * 0.05
    wv = jax.random.normal(kwv, (hidden_size, num_kv_heads * head_dim), jnp.float32) * 0.05
    bq = jax.random.normal(kbq, (num_heads * head_dim,), jnp.float32) * 0.05
    bk = jax.random.normal(kbk, (num_kv_heads * head_dim,), jnp.float32) * 0.05
    bv = jax.random.normal(kbv, (num_kv_heads * head_dim,), jnp.float32) * 0.05

    # Parameter prep: done ONCE, outside the forward hot path.
    w_fused, b_fused = fuse_qkv_params(wq, wk, wv, bq, bk, bv)

    ref = _reference(x, wq, wk, wv, bq, bk, bv, num_heads, num_kv_heads)

    # Auto schedule (weight-resident at these sizes).
    out = repeat_kv_model_forward(x, w_fused, b_fused,
                                  num_heads=num_heads, num_kv_heads=num_kv_heads)
    out = jax.block_until_ready(out)
    assert out.shape == (batch, 3 * num_heads, seq_len, head_dim), out.shape
    np.testing.assert_allclose(np.asarray(out), np.asarray(ref), rtol=1e-5, atol=2e-5)

    # Also exercise the streamed (K-tiled) fallback used on tight-VMEM parts.
    out_s = repeat_kv_model_forward(x, w_fused, b_fused,
                                    num_heads=num_heads, num_kv_heads=num_kv_heads,
                                    schedule="streamed")
    out_s = jax.block_until_ready(out_s)
    np.testing.assert_allclose(np.asarray(out_s), np.asarray(ref), rtol=1e-5, atol=2e-5)

    print("KERNEL_OK")
</pallas_src>

<mosaic_0001>
module attributes {stable_mosaic.version = 11 : i64} {
  func.func @_qkv_repeat_resident_kernel(%arg0: i32, %arg1: i32, %arg2: memref<1x8x32xf32, #tpu.memory_space<vmem>>, %arg3: memref<32x64xf32, #tpu.memory_space<vmem>>, %arg4: memref<1x64xf32, #tpu.memory_space<vmem>>, %arg5: memref<1x12x8x8xf32, #tpu.memory_space<vmem>>) attributes {dimension_semantics = [#tpu.dimension_semantics<parallel>, #tpu.dimension_semantics<parallel>], iteration_bounds = array<i64: 2, 1>, scalar_prefetch = 0 : i64, scratch_operands = 0 : i64, tpu.core_type = #tpu.core_type<tc>, window_params = [{transform_indices = @transform_0, window_bounds = array<i64: 1, 8, 32>}, {pipeline_mode = #tpu.pipeline_mode<synchronous>, transform_indices = @transform_1, window_bounds = array<i64: 32, 64>}, {pipeline_mode = #tpu.pipeline_mode<synchronous>, transform_indices = @transform_2, window_bounds = array<i64: 1, 64>}, {transform_indices = @transform_3, window_bounds = array<i64: 1, 12, 8, 8>}]} {
    %c0 = arith.constant 0 : index
    %c0_0 = arith.constant 0 : index
    %c0_1 = arith.constant 0 : index
    %0 = vector.load %arg2[%c0, %c0_0, %c0_1] : memref<1x8x32xf32, #tpu.memory_space<vmem>>, vector<1x8x32xf32>
    %1 = vector.shape_cast %0 : vector<1x8x32xf32> to vector<8x32xf32>
    %c0_2 = arith.constant 0 : index
    %c0_3 = arith.constant 0 : index
    %2 = vector.load %arg3[%c0_2, %c0_3] : memref<32x64xf32, #tpu.memory_space<vmem>>, vector<32x64xf32>
    %cst = arith.constant dense<0.000000e+00> : vector<8x64xf32>
    %3 = tpu.matmul %1, %2, %cst {dimension_numbers = #tpu.dot_dimension_numbers<[1], [0], [0], [1], [0, 0, 1, 1], [], []>} : vector<8x32xf32>, vector<32x64xf32>, vector<8x64xf32> -> vector<8x64xf32>
    %c0_4 = arith.constant 0 : index
    %c0_5 = arith.constant 0 : index
    %4 = vector.load %arg4[%c0_4, %c0_5] : memref<1x64xf32, #tpu.memory_space<vmem>>, vector<1x64xf32>
    %5 = vector.extract_strided_slice %3 {offsets = [0, 0], sizes = [8, 8], strides = [1, 1]} : vector<8x64xf32> to vector<8x8xf32>
    %6 = vector.extract_strided_slice %4 {offsets = [0, 0], sizes = [1, 8], strides = [1, 1]} : vector<1x64xf32> to vector<1x8xf32>
    %7 = vector.broadcast %6 : vector<1x8xf32> to vector<8x8xf32>
    %8 = arith.addf %5, %7 : vector<8x8xf32>
    %c0_6 = arith.constant 0 : index
    %c0_7 = arith.constant 0 : index
    %c0_8 = arith.constant 0 : index
    %c0_9 = arith.constant 0 : index
    %9 = vector.load %arg5[%c0_6, %c0_7, %c0_8, %c0_9] : memref<1x12x8x8xf32, #tpu.memory_space<vmem>>, vector<1x1x8x8xf32>
    %10 = vector.shape_cast %9 : vector<1x1x8x8xf32> to vector<8x8xf32>
    %11 = vector.shape_cast %8 : vector<8x8xf32> to vector<1x1x8x8xf32>
    tpu.vector_store %arg5[%c0_6, %c0_7, %c0_8, %c0_9], %11 {strides = array<i32>} : memref<1x12x8x8xf32, #tpu.memory_space<vmem>>, vector<1x1x8x8xf32>,
    %12 = vector.extract_strided_slice %3 {offsets = [0, 8], sizes = [8, 8], strides = [1, 1]} : vector<8x64xf32> to vector<8x8xf32>
    %13 = vector.extract_strided_slice %4 {offsets = [0, 8], sizes = [1, 8], strides = [1, 1]} : vector<1x64xf32> to vector<1x8xf32>
    %14 = vector.broadcast %13 : vector<1x8xf32> to vector<8x8xf32>
    %15 = arith.addf %12, %14 : vector<8x8xf32>
    %c0_10 = arith.constant 0 : index
    %c1 = arith.constant 1 : index
    %c0_11 = arith.constant 0 : index
    %c0_12 = arith.constant 0 : index
    %16 = vector.load %arg5[%c0_10, %c1, %c0_11, %c0_12] : memref<1x12x8x8xf32, #tpu.memory_space<vmem>>, vector<1x1x8x8xf32>
    %17 = vector.shape_cast %16 : vector<1x1x8x8xf32> to vector<8x8xf32>
    %18 = vector.shape_cast %15 : vector<8x8xf32> to vector<1x1x8x8xf32>
    tpu.vector_store %arg5[%c0_10, %c1, %c0_11, %c0_12], %18 {strides = array<i32>} : memref<1x12x8x8xf32, #tpu.memory_space<vmem>>, vector<1x1x8x8xf32>,
    %19 = vector.extract_strided_slice %3 {offsets = [0, 16], sizes = [8, 8], strides = [1, 1]} : vector<8x64xf32> to vector<8x8xf32>
    %20 = vector.extract_strided_slice %4 {offsets = [0, 16], sizes = [1, 8], strides = [1, 1]} : vector<1x64xf32> to vector<1x8xf32>
    %21 = vector.broadcast %20 : vector<1x8xf32> to vector<8x8xf32>
    %22 = arith.addf %19, %21 : vector<8x8xf32>
    %c0_13 = arith.constant 0 : index
    %c2 = arith.constant 2 : index
    %c0_14 = arith.constant 0 : index
    %c0_15 = arith.constant 0 : index
    %23 = vector.load %arg5[%c0_13, %c2, %c0_14, %c0_15] : memref<1x12x8x8xf32, #tpu.memory_space<vmem>>, vector<1x1x8x8xf32>
    %24 = vector.shape_cast %23 : vector<1x1x8x8xf32> to vector<8x8xf32>
    %25 = vector.shape_cast %22 : vector<8x8xf32> to vector<1x1x8x8xf32>
    tpu.vector_store %arg5[%c0_13, %c2, %c0_14, %c0_15], %25 {strides = array<i32>} : memref<1x12x8x8xf32, #tpu.memory_space<vmem>>, vector<1x1x8x8xf32>,
    %26 = vector.extract_strided_slice %3 {offsets = [0, 24], sizes = [8, 8], strides = [1, 1]} : vector<8x64xf32> to vector<8x8xf32>
    %27 = vector.extract_strided_slice %4 {offsets = [0, 24], sizes = [1, 8], strides = [1, 1]} : vector<1x64xf32> to vector<1x8xf32>
    %28 = vector.broadcast %27 : vector<1x8xf32> to vector<8x8xf32>
    %29 = arith.addf %26, %28 : vector<8x8xf32>
    %c0_16 = arith.constant 0 : index
    %c3 = arith.constant 3 : index
    %c0_17 = arith.constant 0 : index
    %c0_18 = arith.constant 0 : index
    %30 = vector.load %arg5[%c0_16, %c3, %c0_17, %c0_18] : memref<1x12x8x8xf32, #tpu.memory_space<vmem>>, vector<1x1x8x8xf32>
    %31 = vector.shape_cast %30 : vector<1x1x8x8xf32> to vector<8x8xf32>
    %32 = vector.shape_cast %29 : vector<8x8xf32> to vector<1x1x8x8xf32>
    tpu.vector_store %arg5[%c0_16, %c3, %c0_17, %c0_18], %32 {strides = array<i32>} : memref<1x12x8x8xf32, #tpu.memory_space<vmem>>, vector<1x1x8x8xf32>,
    %33 = vector.extract_strided_slice %3 {offsets = [0, 32], sizes = [8, 8], strides = [1, 1]} : vector<8x64xf32> to vector<8x8xf32>
    %34 = vector.extract_strided_slice %4 {offsets = [0, 32], sizes = [1, 8], strides = [1, 1]} : vector<1x64xf32> to vector<1x8xf32>
    %35 = vector.broadcast %34 : vector<1x8xf32> to vector<8x8xf32>
    %36 = arith.addf %33, %35 : vector<8x8xf32>
    %c0_19 = arith.constant 0 : index
    %c4 = arith.constant 4 : index
    %c0_20 = arith.constant 0 : index
    %c0_21 = arith.constant 0 : index
    %37 = vector.load %arg5[%c0_19, %c4, %c0_20, %c0_21] : memref<1x12x8x8xf32, #tpu.memory_space<vmem>>, vector<1x1x8x8xf32>
    %38 = vector.shape_cast %37 : vector<1x1x8x8xf32> to vector<8x8xf32>
    %39 = vector.shape_cast %36 : vector<8x8xf32> to vector<1x1x8x8xf32>
    tpu.vector_store %arg5[%c0_19, %c4, %c0_20, %c0_21], %39 {strides = array<i32>} : memref<1x12x8x8xf32, #tpu.memory_space<vmem>>, vector<1x1x8x8xf32>,
    %c0_22 = arith.constant 0 : index
    %c5 = arith.constant 5 : index
    %c0_23 = arith.constant 0 : index
    %c0_24 = arith.constant 0 : index
    %40 = vector.load %arg5[%c0_22, %c5, %c0_23, %c0_24] : memref<1x12x8x8xf32, #tpu.memory_space<vmem>>, vector<1x1x8x8xf32>
    %41 = vector.shape_cast %40 : vector<1x1x8x8xf32> to vector<8x8xf32>
    %42 = vector.shape_cast %36 : vector<8x8xf32> to vector<1x1x8x8xf32>
    tpu.vector_store %arg5[%c0_22, %c5, %c0_23, %c0_24], %42 {strides = array<i32>} : memref<1x12x8x8xf32, #tpu.memory_space<vmem>>, vector<1x1x8x8xf32>,
    %43 = vector.extract_strided_slice %3 {offsets = [0, 40], sizes = [8, 8], strides = [1, 1]} : vector<8x64xf32> to vector<8x8xf32>
    %44 = vector.extract_strided_slice %4 {offsets = [0, 40], sizes = [1, 8], strides = [1, 1]} : vector<1x64xf32> to vector<1x8xf32>
    %45 = vector.broadcast %44 : vector<1x8xf32> to vector<8x8xf32>
    %46 = arith.addf %43, %45 : vector<8x8xf32>
    %c0_25 = arith.constant 0 : index
    %c6 = arith.constant 6 : index
    %c0_26 = arith.constant 0 : index
    %c0_27 = arith.constant 0 : index
    %47 = vector.load %arg5[%c0_25, %c6, %c0_26, %c0_27] : memref<1x12x8x8xf32, #tpu.memory_space<vmem>>, vector<1x1x8x8xf32>
    %48 = vector.shape_cast %47 : vector<1x1x8x8xf32> to vector<8x8xf32>
    %49 = vector.shape_cast %46 : vector<8x8xf32> to vector<1x1x8x8xf32>
    tpu.vector_store %arg5[%c0_25, %c6, %c0_26, %c0_27], %49 {strides = array<i32>} : memref<1x12x8x8xf32, #tpu.memory_space<vmem>>, vector<1x1x8x8xf32>,
    %c0_28 = arith.constant 0 : index
    %c7 = arith.constant 7 : index
    %c0_29 = arith.constant 0 : index
    %c0_30 = arith.constant 0 : index
    %50 = vector.load %arg5[%c0_28, %c7, %c0_29, %c0_30] : memref<1x12x8x8xf32, #tpu.memory_space<vmem>>, vector<1x1x8x8xf32>
    %51 = vector.shape_cast %50 : vector<1x1x8x8xf32> to vector<8x8xf32>
    %52 = vector.shape_cast %46 : vector<8x8xf32> to vector<1x1x8x8xf32>
    tpu.vector_store %arg5[%c0_28, %c7, %c0_29, %c0_30], %52 {strides = array<i32>} : memref<1x12x8x8xf32, #tpu.memory_space<vmem>>, vector<1x1x8x8xf32>,
    %53 = vector.extract_strided_slice %3 {offsets = [0, 48], sizes = [8, 8], strides = [1, 1]} : vector<8x64xf32> to vector<8x8xf32>
    %54 = vector.extract_strided_slice %4 {offsets = [0, 48], sizes = [1, 8], strides = [1, 1]} : vector<1x64xf32> to vector<1x8xf32>
    %55 = vector.broadcast %54 : vector<1x8xf32> to vector<8x8xf32>
    %56 = arith.addf %53, %55 : vector<8x8xf32>
    %c0_31 = arith.constant 0 : index
    %c8 = arith.constant 8 : index
    %c0_32 = arith.constant 0 : index
    %c0_33 = arith.constant 0 : index
    %57 = vector.load %arg5[%c0_31, %c8, %c0_32, %c0_33] : memref<1x12x8x8xf32, #tpu.memory_space<vmem>>, vector<1x1x8x8xf32>
    %58 = vector.shape_cast %57 : vector<1x1x8x8xf32> to vector<8x8xf32>
    %59 = vector.shape_cast %56 : vector<8x8xf32> to vector<1x1x8x8xf32>
    tpu.vector_store %arg5[%c0_31, %c8, %c0_32, %c0_33], %59 {strides = array<i32>} : memref<1x12x8x8xf32, #tpu.memory_space<vmem>>, vector<1x1x8x8xf32>,
    %c0_34 = arith.constant 0 : index
    %c9 = arith.constant 9 : index
    %c0_35 = arith.constant 0 : index
    %c0_36 = arith.constant 0 : index
    %60 = vector.load %arg5[%c0_34, %c9, %c0_35, %c0_36] : memref<1x12x8x8xf32, #tpu.memory_space<vmem>>, vector<1x1x8x8xf32>
    %61 = vector.shape_cast %60 : vector<1x1x8x8xf32> to vector<8x8xf32>
    %62 = vector.shape_cast %56 : vector<8x8xf32> to vector<1x1x8x8xf32>
    tpu.vector_store %arg5[%c0_34, %c9, %c0_35, %c0_36], %62 {strides = array<i32>} : memref<1x12x8x8xf32, #tpu.memory_space<vmem>>, vector<1x1x8x8xf32>,
    %63 = vector.extract_strided_slice %3 {offsets = [0, 56], sizes = [8, 8], strides = [1, 1]} : vector<8x64xf32> to vector<8x8xf32>
    %64 = vector.extract_strided_slice %4 {offsets = [0, 56], sizes = [1, 8], strides = [1, 1]} : vector<1x64xf32> to vector<1x8xf32>
    %65 = vector.broadcast %64 : vector<1x8xf32> to vector<8x8xf32>
    %66 = arith.addf %63, %65 : vector<8x8xf32>
    %c0_37 = arith.constant 0 : index
    %c10 = arith.constant 10 : index
    %c0_38 = arith.constant 0 : index
    %c0_39 = arith.constant 0 : index
    %67 = vector.load %arg5[%c0_37, %c10, %c0_38, %c0_39] : memref<1x12x8x8xf32, #tpu.memory_space<vmem>>, vector<1x1x8x8xf32>
    %68 = vector.shape_cast %67 : vector<1x1x8x8xf32> to vector<8x8xf32>
    %69 = vector.shape_cast %66 : vector<8x8xf32> to vector<1x1x8x8xf32>
    tpu.vector_store %arg5[%c0_37, %c10, %c0_38, %c0_39], %69 {strides = array<i32>} : memref<1x12x8x8xf32, #tpu.memory_space<vmem>>, vector<1x1x8x8xf32>,
    %c0_40 = arith.constant 0 : index
    %c11 = arith.constant 11 : index
    %c0_41 = arith.constant 0 : index
    %c0_42 = arith.constant 0 : index
    %70 = vector.load %arg5[%c0_40, %c11, %c0_41, %c0_42] : memref<1x12x8x8xf32, #tpu.memory_space<vmem>>, vector<1x1x8x8xf32>
    %71 = vector.shape_cast %70 : vector<1x1x8x8xf32> to vector<8x8xf32>
    %72 = vector.shape_cast %66 : vector<8x8xf32> to vector<1x1x8x8xf32>
    tpu.vector_store %arg5[%c0_40, %c11, %c0_41, %c0_42], %72 {strides = array<i32>} : memref<1x12x8x8xf32, #tpu.memory_space<vmem>>, vector<1x1x8x8xf32>,
    return
  }
  func.func @transform_0(%arg0: i32, %arg1: i32) -> (i32, i32, i32) {
    %c0_i32 = arith.constant 0 : i32
    %c0_i32_0 = arith.constant 0 : i32
    return %arg0, %arg1, %c0_i32 : i32, i32, i32
  }
  func.func @transform_1(%arg0: i32, %arg1: i32) -> (i32, i32) {
    %c0_i32 = arith.constant 0 : i32
    %c0_i32_0 = arith.constant 0 : i32
    %c0_i32_1 = arith.constant 0 : i32
    return %c0_i32, %c0_i32_0 : i32, i32
  }
  func.func @transform_2(%arg0: i32, %arg1: i32) -> (i32, i32) {
    %c0_i32 = arith.constant 0 : i32
    %c0_i32_0 = arith.constant 0 : i32
    %c0_i32_1 = arith.constant 0 : i32
    return %c0_i32, %c0_i32_0 : i32, i32
  }
  func.func @transform_3(%arg0: i32, %arg1: i32) -> (i32, i32, i32, i32) {
    %c0_i32 = arith.constant 0 : i32
    %c0_i32_0 = arith.constant 0 : i32
    %c0_i32_1 = arith.constant 0 : i32
    return %arg0, %c0_i32, %arg1, %c0_i32_0 : i32, i32, i32, i32
  }
}

</mosaic_0001>

<bundles_post_ra>
// kernel: tpu_custom_call.1
= control target key start
LH: loop header
LB: loop body
LE: loop exit
PB: predicated region body
PF: predicated region fallthrough
CT: control target
= control target key end

     0   :  { %8 = vsyncpa [#allocation3], 0  ;;  %s801_s0 = inlined_call_operand.hbm [shape: f32[2,8,32], index: 0, kind: input, shape index: {}]   ;;  %s802_s1 = inlined_call_operand.hbm [shape: f32[32,64], index: 1, kind: input, shape index: {}]   ;;  %s803_s2 = inlined_call_operand.vmem [shape: f32[1,64], index: 2, kind: input, shape index: {}]   ;;  %s804_s3 = inlined_call_operand.vmem [shape: f32[2,12,8,8], index: 3, kind: output, shape index: {}]  }
   0x1   :  { %10 = vsyncpa [#allocation3 + $0x1], 0 }
   0x2   :  { %11 = vsyncpa [#allocation5], 0  ;;  %s658_s12 = smov 0   ;;  %s660_s13 = smov 0  }
   0x3   :  { %s662_s14 = smov 0   ;;  %s664_s15 = smov 0  }
   0x4   :  { %s666_s16 = smov 0   ;;  %s668_s17 = smov 0  }
   0x5 LB: > { %s410_s18 = sadd.s32 4294967295, %s626_s17   ;;  %p412_p0 = scmp.ge.s32.totalorder %s626_s17, 1  ;;  %s626_s17 = sphi %s668_s17, %s17_s17   ;;  %s622_s16 = sphi %s666_s16, %s813_s16   ;;  %s618_s15 = sphi %s664_s15, %s812_s15   ;;  %s614_s14 = sphi %s662_s14, %s811_s14   ;;  %s610_s13 = sphi %s660_s13, %s810_s13   ;;  %s606_s12 = sphi %s658_s12, %s809_s12  }
   0x6   : > { %p690_p1 = scmp.eq.s32.totalorder %s410_s18, 0  ;;  %p132_p2 = scmp.lt.s32.totalorder %s626_s17, 3 }
   0x7   : > { %s143_s22 = sshll.u32 %s802_s1, 4  ;;  %s628_s24 = smov [#allocation4]   ;;  %s144_s22 = int_to_ptr.hbm [resolvable:$true] %s143_s22 }
   0x8   : > { %p698_p3 = pnand %p412_p0, %p132_p2  ;;  %s145_s25 = sshll.u32 %s628_s24, 4  ;;  %s146_s25 = int_to_ptr.vmem [resolvable:$true] %s145_s25 }
   0x9   : > { %s629_s26 = smov 128   ;;  %s630_s27 = smov 8  }
   0xa   : > { %p442_p4 = pneg %p698_p3  ;;  %s29_s28 = sadd.s32 1, %s622_s16 }
   0xb   : > { %p31_p6 = scmp.ge.s32.totalorder %s29_s28, 2  ;;  %p45_p7 = scmp.ne.s32.totalorder %s614_s14, %s610_s13 }
   0xc   : > { %p443_p5 = pnand %p442_p4, %p690_p1  ;;  %p46_p8 = scmp.eq.s32.totalorder %s626_s17, 0 }
   0xd   : > { %s815_s28 = smov (%p31_p6, %s29_s28), 0  ;;  %s38_s29 = sadd.s32 1, %s614_s14 }
   0xe   : > { %445 = dma.hbm_to_vmem [thread:$0]  (!%p443_p5), %s144_s22, 512, %s146_s25, [#allocation5], %s629_s26, %s629_s26, %s630_s27  }
   0xf   : > { %p51_p9 = scmp.ne.s32.totalorder %s610_s13, %s606_s12  ;;  %s33_s30 = ssub.s32 %s622_s16, %s815_s28 }
  0x10   : > { %p717_p10 = por %p46_p8, %p45_p7  ;;  %p36_p11 = scmp.eq.s32.totalorder %s33_s30, 0 }
  0x11   : > { %p723_p12 = por %p690_p1, %p51_p9  ;;  %s162_s6 = sand.u32 1, %s614_s14  }
  0x12   : > { %s416_s7 = sshll.u32 %s622_s16, 3  ;;  %p451_p13 = scmp.lt.s32.totalorder %s626_s17, 2 }
  0x13   : > { %s730_s8 = scalar_select %p36_p11, %s614_s14, %s38_s29  }
  0x14   : > { %s415_s9 = sshll.u32 %s162_s6, 3  ;;  %s171_s12 = scalar_lea.hbm %s801_s0, %s416_s7 }
  0x15   : > { %s173_s18 = sshll.u32 %s171_s12, 4  ;;  %s166_s20 = scalar_lea.vmem [#allocation2], %s415_s9  ;;  %s174_s18 = int_to_ptr.hbm [resolvable:$true] %s173_s18 }
  0x16   : > { %s175_s21 = sshll.u32 %s166_s20, 4  ;;  %p447_p0 = pnand %p451_p13, %p717_p10  ;;  %s176_s21 = int_to_ptr.vmem [resolvable:$true] %s175_s21 }
  0x17   : > { %s163_s22 = scalar_lea.sflag [#allocation3], %s162_s6  ;;  %184 = sbr.rel (%p698_p3) target bundleno = 301 (0x12d), region = 32 }
  0x18   : > { %449 = dma.hbm_to_vmem [thread:$0]  (!%p447_p0), %s174_s18, 128, %s176_s21, %s163_s22  }
  0x19   : > { %s186_s24 = sand.u32 (!%p698_p3), 1, %s610_s13  }
  0x1a   : > { %s418_s25 = sshll.u32 (!%p698_p3), %s186_s24, 3  ;;  %s187_s26 = scalar_lea.sflag (!%p698_p3), [#allocation3], %s186_s24 }
  0x1b   : > { %s190_s27 = scalar_lea.vmem (!%p698_p3), [#allocation2], %s418_s25 }
  0x1c   : > { %597 = dma.done.wait (%p723_p12), %s187_s26, 128  }
  0x1d   : > { %599 = vsyncadd (%p723_p12), %s187_s26, 4294967168 }
  0x1e   : > { %601 = dma.done.wait (%p690_p1), [#allocation5], 512  }
  0x1f   : > { %603 = vsyncadd (%p690_p1), [#allocation5], 4294966784  ;;  %v234_v0 = vld [vmem:[#allocation4 + $0x18] sm:$0xff]  ;;  %v233_v1 = vld [vmem:[#allocation4 + $0x10] sm:$0xff]  ;;  %vm235_vm0 = vcmask 261120   ;;  %p222_p2 = scmp.lt.s32.totalorder %s618_s15, 1 }
  0x20   : > { %251 = vmatpush.msra.mxu0 %v234_v0  ;;  %v232_v2 = vld [vmem:[#allocation4 + $0x8] sm:$0xff]  ;;  %v231_v3 = vld [vmem:[#allocation4] sm:$0xff]  ;;  %v230_v4 = vld [vmem:[%s190_s27] sm:$0xff]  ;;  %vm264_vm1 = vcmask 64512   ;;  %s631_s6 = smov 88   ;;  %s633_s7 = smov 120  }
  0x21   : > { %s817_s15 = smov (!%p222_p2, %s618_s15), 1  ;;  %v511_v5 = vld [vmem:[%s803_s2] ss:$0 sm:$0xff]  ;;  %s634_s9 = smov 80  }
  0x22   : > { %252 = vmatpush.msra.mxu0 %v233_v1  ;;  %s435_s23 = smul.u32 96, %s817_s15  ;;  %s632_s15 = smov 104  }
  0x23   : > { %s635_s10 = smov 96   ;;  %s636_s11 = smov 112  }
  0x24   : > { %253 = vmatpush.msra.mxu0 %v232_v2  ;;  %s757_s5 = scalar_lea.vmem %s804_s3, %s435_s23  ;;  %s637_s12 = smov 72  }
  0x26   : > { %254 = vmatpush.msra.mxu0 %v231_v3 }
  0x27   : > { %421 = vmatmul.msk.f32.vlgmr.msra.gmra.mxu0 %vm235_vm0, %v230_v4 }
  0xa4   : > { %v256_v6 = vpop.f32.mrf.mxu0 }
  0xa5   : > { %v263_v7 = vadd.f32 %v511_v5, %v256_v6 }
  0xa7   : > { %265 = vst.msk [vmem:[%s757_s5] sm:$0xff] %vm264_vm1, %v263_v7  ;;  %289 = vrot.lane.b32.xlu2 %v263_v7, %s631_s6  ;;  %277 = vrot.lane.b32.xlu1 %v263_v7, %s632_s15 }
  0xa8   : > { %267 = vrot.lane.b32.xlu0 %v263_v7, %s633_s7 }
  0xaf   : > { %296 = vrot.lane.b32.xlu2 %v263_v7, %s634_s9  ;;  %282 = vrot.lane.b32.xlu1 %v263_v7, %s635_s10 }
  0xb0   : > { %272 = vrot.lane.b32.xlu0 %v263_v7, %s636_s11 }
  0xb8   : > { %303 = vrot.lane.b32.xlu0 %v263_v7, %s637_s12 }
 0x101   : > { %v290_v8 = vpop.permute.xlu2 %289 }
 0x102   : > { %427 = vst.msk [vmem:[%s757_s5 + $0x30] sm:$0xff] %vm264_vm1, %v290_v8 }
 0x103   : > { %428 = vst.msk [vmem:[%s757_s5 + $0x38] sm:$0xff] %vm264_vm1, %v290_v8 }
 0x109   : > { %v297_v9 = vpop.permute.xlu2 %296 }
 0x10a   : > { %429 = vst.msk [vmem:[%s757_s5 + $0x40] sm:$0xff] %vm264_vm1, %v297_v9 }
 0x10b   : > { %430 = vst.msk [vmem:[%s757_s5 + $0x48] sm:$0xff] %vm264_vm1, %v297_v9 }
 0x119   : > { %v278_v10 = vpop.permute.xlu1 %277 }
 0x11a   : > { %424 = vst.msk [vmem:[%s757_s5 + $0x18] sm:$0xff] %vm264_vm1, %v278_v10  ;;  %v268_v11 = vpop.permute.xlu0 %267 }
 0x11b   : > { %422 = vst.msk [vmem:[%s757_s5 + $0x8] sm:$0xff] %vm264_vm1, %v268_v11 }
 0x121   : > { %v283_v12 = vpop.permute.xlu1 %282 }
 0x122   : > { %425 = vst.msk [vmem:[%s757_s5 + $0x20] sm:$0xff] %vm264_vm1, %v283_v12  ;;  %v273_v13 = vpop.permute.xlu0 %272 }
 0x123   : > { %426 = vst.msk [vmem:[%s757_s5 + $0x28] sm:$0xff] %vm264_vm1, %v283_v12 }
 0x124   : > { %423 = vst.msk [vmem:[%s757_s5 + $0x10] sm:$0xff] %vm264_vm1, %v273_v13 }
 0x12a   : > { %v304_v14 = vpop.permute.xlu0 %303 }
 0x12b   : > { %431 = vst.msk [vmem:[%s757_s5 + $0x50] sm:$0xff] %vm264_vm1, %v304_v14 }
 0x12c   : > { %432 = vst.msk [vmem:[%s757_s5 + $0x58] sm:$0xff] %vm264_vm1, %v304_v14 }
 0x12d PF: > { %s17_s17 = sadd.s32 1, %s626_s17   ;;  %s809_s12 = smov %s610_s13 }
 0x12e   : > { %p14_p1 = scmp.ge.s32.totalorder %s17_s17, 4   ;;  %s810_s13 = smov %s614_s14 }
 0x12f   : > { %s811_s14 = smov %s730_s8  ;;  %s812_s15 = smov %s622_s16 }
 0x130   : > { %s813_s16 = smov %s815_s28  ;;  %16 = sbr.rel (!%p14_p1) target bundleno = 5 (0x5), region = 87 }
 0x135   :  { %337 = vsyncpa [#allocation3], 1 }
 0x136   :  { %339 = vsyncpa [#allocation3 + $0x1], 1 }
 0x137   :  { %340 = vsyncpa [#allocation5], 1 }

</bundles_post_ra>
